<compile_context>
chip_gen: v7x
topology: tpu7x:2x2x1
jax: 0.10.0
libtpu: 0.0.40
codegen_flags: <defaults>
</compile_context>

<pallas_src>
import functools

import jax
import jax.numpy as jnp
from jax.experimental import pallas as pl
from jax.experimental.pallas import tpu as pltpu

# ---- model hyper-parameters (synthetic, small) ------------------------------
NUM_FLOWS = 4          # number of additive coupling layers
IN_DIM    = 32         # flattened input dim D
HALF      = IN_DIM // 2
HIDDEN    = 32         # MLP hidden width inside each coupling layer
BLOCK_B   = 2048       # max batch-lane columns per grid step


def _round_up(x, m):
    return (x + m - 1) // m * m


def nice_forward_kernel(x_ref, w1_ref, w2_ref, b1_ref, b2_ref, scale_ref,
                        z_ref):
    """One batch-block of the NICE encode pass, feature-major layout.

    x_ref     : [IN_DIM, BM]            input block, x^T (f32)
    w1_ref    : [NUM_FLOWS, HIDDEN, HALF]   layer-1 weights, pre-transposed
    w2_ref    : [NUM_FLOWS, HALF, HIDDEN]   layer-2 weights, pre-transposed
    b1_ref    : [NUM_FLOWS, HIDDEN, 1]      layer-1 biases (column vectors)
    b2_ref    : [NUM_FLOWS, HALF, 1]        layer-2 biases (column vectors)
    scale_ref : [IN_DIM, 1]                 exp(s), precomputed in wrapper
    z_ref     : [IN_DIM, BM]            output block, z^T (f32)
    """
    # Half-split is a tile-aligned sublane slice (rows 0:16 / 16:32).
    x1 = x_ref[:HALF, :]          # [HALF,  BM]
    x2 = x_ref[HALF:, :]          # [HALF,  BM]

    # Additive coupling layers (log-det of each is 0).  Static unrolled loop.
    # All math in f32; MXU N-dim = BM (>=128), dots in f32 (no casts).
    for i in range(NUM_FLOWS):
        w1t = w1_ref[i]           # [HIDDEN, HALF]
        b1t = b1_ref[i]           # [HIDDEN, 1]   (broadcast over lanes)
        w2t = w2_ref[i]           # [HALF, HIDDEN]
        b2t = b2_ref[i]           # [HALF, 1]

        src = x1 if i % 2 == 0 else x2
        h = jnp.maximum(
            jnp.dot(w1t, src, preferred_element_type=jnp.float32) + b1t, 0.0)
        m = jnp.dot(w2t, h, preferred_element_type=jnp.float32) + b2t
        if i % 2 == 0:
            x2 = x2 + m           # y1 = x1 ; y2 = x2 + m(x1)
        else:
            x1 = x1 + m           # y2 = x2 ; y1 = x1 + m(x2)

    # Scale layer: z = y * exp(s).  Two sublane-aligned, full-lane stores
    # (no concatenate / relayout).  log|det J| = sum(s) is done in wrapper.
    z_ref[:HALF, :] = x1 * scale_ref[:HALF, :]
    z_ref[HALF:, :] = x2 * scale_ref[HALF:, :]


@functools.partial(jax.jit, static_argnames=("block_b",))
def nice_forward(x, params, block_b=BLOCK_B):
    """NICE.forward: x [B, IN_DIM] -> (z [B, IN_DIM], log_det_J [B])."""
    W1T, W2T, B1, B2, s = params
    B, D = x.shape
    assert D == IN_DIM

    # Param-only quantities computed once outside the kernel.
    scale_t = jnp.exp(s).reshape(IN_DIM, 1)    # [IN_DIM, 1] feature-major
    log_det = jnp.sum(s)                       # scalar

    # Batch-lane blocking: cover the batch in ~2 big steps (keeps both v7x
    # TensorCores busy via the "parallel" axis), lanes a multiple of 128
    # (256 for typical B, which also feeds the full v6e 256-wide MXU),
    # capped at block_b.  (32, 2048) f32 is only 256 KB -> VMEM is a non-issue.
    bm = min(block_b, max(128, _round_up(pl.cdiv(B, 2), 128)))
    b_pad = _round_up(B, bm)

    xt = x.T                                   # [IN_DIM, B] feature-major
    if b_pad != B:
        xt = jnp.pad(xt, ((0, 0), (0, b_pad - B)))

    zt = pl.pallas_call(
        nice_forward_kernel,
        out_shape=jax.ShapeDtypeStruct((IN_DIM, b_pad), jnp.float32),
        grid=(b_pad // bm,),
        in_specs=[
            pl.BlockSpec((IN_DIM, bm), lambda i: (0, i)),
            # Constant index_maps -> weights/biases/scale stay resident.
            pl.BlockSpec((NUM_FLOWS, HIDDEN, HALF), lambda i: (0, 0, 0)),
            pl.BlockSpec((NUM_FLOWS, HALF, HIDDEN), lambda i: (0, 0, 0)),
            pl.BlockSpec((NUM_FLOWS, HIDDEN, 1), lambda i: (0, 0, 0)),
            pl.BlockSpec((NUM_FLOWS, HALF, 1), lambda i: (0, 0, 0)),
            pl.BlockSpec((IN_DIM, 1), lambda i: (0, 0)),
        ],
        out_specs=pl.BlockSpec((IN_DIM, bm), lambda i: (0, i)),
        compiler_params=pltpu.CompilerParams(
            dimension_semantics=("parallel",)),
    )(xt, W1T, W2T, B1, B2, scale_t)

    z = zt[:, :B].T
    # log_det_J only depends on s; broadcast per example (standard NICE).
    log_det_J = jnp.broadcast_to(log_det, (B,))
    return z, log_det_J


def nice_forward_ref(x, params):
    """Pure-JAX f32 reference (highest-precision dots) for correctness."""
    W1T, W2T, B1, B2, s = params
    hp = jax.lax.Precision.HIGHEST
    x1, x2 = x[:, :HALF], x[:, HALF:]
    for i in range(NUM_FLOWS):
        w1 = W1T[i].T            # [HALF, HIDDEN]
        b1 = B1[i, :, 0]         # [HIDDEN]
        w2 = W2T[i].T            # [HIDDEN, HALF]
        b2 = B2[i, :, 0]         # [HALF]
        src = x1 if i % 2 == 0 else x2
        h = jnp.maximum(jnp.dot(src, w1, precision=hp) + b1, 0.0)
        m = jnp.dot(h, w2, precision=hp) + b2
        if i % 2 == 0:
            x2 = x2 + m
        else:
            x1 = x1 + m
    z = jnp.concatenate([x1, x2], axis=-1) * jnp.exp(s)
    log_det_J = jnp.broadcast_to(jnp.sum(s), (x.shape[0],))
    return z, log_det_J


def init_params(key):
    """Deterministic synthetic parameters, pre-transposed for the kernel."""
    ks = jax.random.split(key, 5)
    w1 = 0.1 * jax.random.normal(ks[0], (NUM_FLOWS, HALF, HIDDEN), jnp.float32)
    b1 = 0.1 * jax.random.normal(ks[1], (NUM_FLOWS, HIDDEN), jnp.float32)
    w2 = 0.1 * jax.random.normal(ks[2], (NUM_FLOWS, HIDDEN, HALF), jnp.float32)
    b2 = 0.1 * jax.random.normal(ks[3], (NUM_FLOWS, HALF), jnp.float32)
    s  = 0.1 * jax.random.normal(ks[4], (IN_DIM,), jnp.float32)
    W1T = jnp.transpose(w1, (0, 2, 1))   # [F, HIDDEN, HALF]
    W2T = jnp.transpose(w2, (0, 2, 1))   # [F, HALF, HIDDEN]
    B1 = b1[:, :, None]                  # [F, HIDDEN, 1]
    B2 = b2[:, :, None]                  # [F, HALF, 1]
    return (W1T, W2T, B1, B2, s)


# TODO(synk): decode()/generate()/prior sampling and the dequantization +
# loss plumbing are outside the module's forward() and are not implemented.

if __name__ == "__main__":
    key = jax.random.PRNGKey(0)
    kx, kp = jax.random.split(key)
    params = init_params(kp)

    ok = True
    # Small, exact-multiple and ragged batch sizes.
    for b in (8, 200, 512):
        x = jax.random.normal(jax.random.fold_in(kx, b), (b, IN_DIM),
                              jnp.float32)
        z, log_det_J = nice_forward(x, params)
        jax.block_until_ready((z, log_det_J))

        z_ref, ld_ref = nice_forward_ref(x, params)
        # Dots run in f32 (no explicit bf16 casts); tolerance kept with margin
        # for generation-dependent default-precision MXU pass decomposition,
        # but tighter than the previous bf16-cast version.
        ok &= bool(jnp.allclose(z, z_ref, atol=1e-2, rtol=1e-2))
        ok &= bool(jnp.allclose(log_det_J, ld_ref, atol=1e-5))
        ok &= (z.shape == (b, IN_DIM)) and (log_det_J.shape == (b,))

    assert ok, "kernel output mismatch vs reference"
    print("KERNEL_OK")
</pallas_src>

<mosaic_0001>
module attributes {stable_mosaic.version = 11 : i64} {
  func.func @nice_forward_kernel(%arg0: i32, %arg1: memref<32x128xf32, #tpu.memory_space<vmem>>, %arg2: memref<4x32x16xf32, #tpu.memory_space<vmem>>, %arg3: memref<4x16x32xf32, #tpu.memory_space<vmem>>, %arg4: memref<4x32x1xf32, #tpu.memory_space<vmem>>, %arg5: memref<4x16x1xf32, #tpu.memory_space<vmem>>, %arg6: memref<32x1xf32, #tpu.memory_space<vmem>>, %arg7: memref<32x128xf32, #tpu.memory_space<vmem>>) attributes {dimension_semantics = [#tpu.dimension_semantics<parallel>], iteration_bounds = array<i64: 1>, scalar_prefetch = 0 : i64, scratch_operands = 0 : i64, tpu.core_type = #tpu.core_type<tc>, window_params = [{transform_indices = @transform_0, window_bounds = array<i64: 32, 128>}, {pipeline_mode = #tpu.pipeline_mode<synchronous>, transform_indices = @transform_1, window_bounds = array<i64: 4, 32, 16>}, {pipeline_mode = #tpu.pipeline_mode<synchronous>, transform_indices = @transform_2, window_bounds = array<i64: 4, 16, 32>}, {pipeline_mode = #tpu.pipeline_mode<synchronous>, transform_indices = @transform_3, window_bounds = array<i64: 4, 32, 1>}, {pipeline_mode = #tpu.pipeline_mode<synchronous>, transform_indices = @transform_4, window_bounds = array<i64: 4, 16, 1>}, {pipeline_mode = #tpu.pipeline_mode<synchronous>, transform_indices = @transform_5, window_bounds = array<i64: 32, 1>}, {transform_indices = @transform_6, window_bounds = array<i64: 32, 128>}]} {
    %c0 = arith.constant 0 : index
    %c0_0 = arith.constant 0 : index
    %0 = vector.load %arg1[%c0, %c0_0] : memref<32x128xf32, #tpu.memory_space<vmem>>, vector<16x128xf32>
    %c16 = arith.constant 16 : index
    %c0_1 = arith.constant 0 : index
    %1 = vector.load %arg1[%c16, %c0_1] : memref<32x128xf32, #tpu.memory_space<vmem>>, vector<16x128xf32>
    %c0_2 = arith.constant 0 : index
    %c0_3 = arith.constant 0 : index
    %c0_4 = arith.constant 0 : index
    %2 = vector.load %arg2[%c0_2, %c0_3, %c0_4] : memref<4x32x16xf32, #tpu.memory_space<vmem>>, vector<1x32x16xf32>
    %3 = vector.shape_cast %2 : vector<1x32x16xf32> to vector<32x16xf32>
    %c0_5 = arith.constant 0 : index
    %c0_6 = arith.constant 0 : index
    %c0_7 = arith.constant 0 : index
    %4 = vector.load %arg4[%c0_5, %c0_6, %c0_7] : memref<4x32x1xf32, #tpu.memory_space<vmem>>, vector<1x32x1xf32>
    %5 = vector.shape_cast %4 : vector<1x32x1xf32> to vector<32x1xf32>
    %c0_8 = arith.constant 0 : index
    %c0_9 = arith.constant 0 : index
    %c0_10 = arith.constant 0 : index
    %6 = vector.load %arg3[%c0_8, %c0_9, %c0_10] : memref<4x16x32xf32, #tpu.memory_space<vmem>>, vector<1x16x32xf32>
    %7 = vector.shape_cast %6 : vector<1x16x32xf32> to vector<16x32xf32>
    %c0_11 = arith.constant 0 : index
    %c0_12 = arith.constant 0 : index
    %c0_13 = arith.constant 0 : index
    %8 = vector.load %arg5[%c0_11, %c0_12, %c0_13] : memref<4x16x1xf32, #tpu.memory_space<vmem>>, vector<1x16x1xf32>
    %9 = vector.shape_cast %8 : vector<1x16x1xf32> to vector<16x1xf32>
    %cst = arith.constant dense<0.000000e+00> : vector<32x128xf32>
    %10 = tpu.matmul %3, %0, %cst {dimension_numbers = #tpu.dot_dimension_numbers<[1], [0], [0], [1], [0, 0, 1, 1], [], []>} : vector<32x16xf32>, vector<16x128xf32>, vector<32x128xf32> -> vector<32x128xf32>
    %11 = vector.broadcast %5 : vector<32x1xf32> to vector<32x128xf32>
    %12 = arith.addf %10, %11 : vector<32x128xf32>
    %cst_14 = arith.constant 0.000000e+00 : f32
    %13 = vector.broadcast %cst_14 : f32 to vector<32x128xf32>
    %14 = arith.maximumf %12, %13 : vector<32x128xf32>
    %cst_15 = arith.constant dense<0.000000e+00> : vector<16x128xf32>
    %15 = tpu.matmul %7, %14, %cst_15 {dimension_numbers = #tpu.dot_dimension_numbers<[1], [0], [0], [1], [0, 0, 1, 1], [], []>} : vector<16x32xf32>, vector<32x128xf32>, vector<16x128xf32> -> vector<16x128xf32>
    %16 = vector.broadcast %9 : vector<16x1xf32> to vector<16x128xf32>
    %17 = arith.addf %15, %16 : vector<16x128xf32>
    %18 = arith.addf %1, %17 : vector<16x128xf32>
    %c1 = arith.constant 1 : index
    %c0_16 = arith.constant 0 : index
    %c0_17 = arith.constant 0 : index
    %19 = vector.load %arg2[%c1, %c0_16, %c0_17] : memref<4x32x16xf32, #tpu.memory_space<vmem>>, vector<1x32x16xf32>
    %20 = vector.shape_cast %19 : vector<1x32x16xf32> to vector<32x16xf32>
    %c1_18 = arith.constant 1 : index
    %c0_19 = arith.constant 0 : index
    %c0_20 = arith.constant 0 : index
    %21 = vector.load %arg4[%c1_18, %c0_19, %c0_20] : memref<4x32x1xf32, #tpu.memory_space<vmem>>, vector<1x32x1xf32>
    %22 = vector.shape_cast %21 : vector<1x32x1xf32> to vector<32x1xf32>
    %c1_21 = arith.constant 1 : index
    %c0_22 = arith.constant 0 : index
    %c0_23 = arith.constant 0 : index
    %23 = vector.load %arg3[%c1_21, %c0_22, %c0_23] : memref<4x16x32xf32, #tpu.memory_space<vmem>>, vector<1x16x32xf32>
    %24 = vector.shape_cast %23 : vector<1x16x32xf32> to vector<16x32xf32>
    %c1_24 = arith.constant 1 : index
    %c0_25 = arith.constant 0 : index
    %c0_26 = arith.constant 0 : index
    %25 = vector.load %arg5[%c1_24, %c0_25, %c0_26] : memref<4x16x1xf32, #tpu.memory_space<vmem>>, vector<1x16x1xf32>
    %26 = vector.shape_cast %25 : vector<1x16x1xf32> to vector<16x1xf32>
    %cst_27 = arith.constant dense<0.000000e+00> : vector<32x128xf32>
    %27 = tpu.matmul %20, %18, %cst_27 {dimension_numbers = #tpu.dot_dimension_numbers<[1], [0], [0], [1], [0, 0, 1, 1], [], []>} : vector<32x16xf32>, vector<16x128xf32>, vector<32x128xf32> -> vector<32x128xf32>
    %28 = vector.broadcast %22 : vector<32x1xf32> to vector<32x128xf32>
    %29 = arith.addf %27, %28 : vector<32x128xf32>
    %cst_28 = arith.constant 0.000000e+00 : f32
    %30 = vector.broadcast %cst_28 : f32 to vector<32x128xf32>
    %31 = arith.maximumf %29, %30 : vector<32x128xf32>
    %cst_29 = arith.constant dense<0.000000e+00> : vector<16x128xf32>
    %32 = tpu.matmul %24, %31, %cst_29 {dimension_numbers = #tpu.dot_dimension_numbers<[1], [0], [0], [1], [0, 0, 1, 1], [], []>} : vector<16x32xf32>, vector<32x128xf32>, vector<16x128xf32> -> vector<16x128xf32>
    %33 = vector.broadcast %26 : vector<16x1xf32> to vector<16x128xf32>
    %34 = arith.addf %32, %33 : vector<16x128xf32>
    %35 = arith.addf %0, %34 : vector<16x128xf32>
    %c2 = arith.constant 2 : index
    %c0_30 = arith.constant 0 : index
    %c0_31 = arith.constant 0 : index
    %36 = vector.load %arg2[%c2, %c0_30, %c0_31] : memref<4x32x16xf32, #tpu.memory_space<vmem>>, vector<1x32x16xf32>
    %37 = vector.shape_cast %36 : vector<1x32x16xf32> to vector<32x16xf32>
    %c2_32 = arith.constant 2 : index
    %c0_33 = arith.constant 0 : index
    %c0_34 = arith.constant 0 : index
    %38 = vector.load %arg4[%c2_32, %c0_33, %c0_34] : memref<4x32x1xf32, #tpu.memory_space<vmem>>, vector<1x32x1xf32>
    %39 = vector.shape_cast %38 : vector<1x32x1xf32> to vector<32x1xf32>
    %c2_35 = arith.constant 2 : index
    %c0_36 = arith.constant 0 : index
    %c0_37 = arith.constant 0 : index
    %40 = vector.load %arg3[%c2_35, %c0_36, %c0_37] : memref<4x16x32xf32, #tpu.memory_space<vmem>>, vector<1x16x32xf32>
    %41 = vector.shape_cast %40 : vector<1x16x32xf32> to vector<16x32xf32>
    %c2_38 = arith.constant 2 : index
    %c0_39 = arith.constant 0 : index
    %c0_40 = arith.constant 0 : index
    %42 = vector.load %arg5[%c2_38, %c0_39, %c0_40] : memref<4x16x1xf32, #tpu.memory_space<vmem>>, vector<1x16x1xf32>
    %43 = vector.shape_cast %42 : vector<1x16x1xf32> to vector<16x1xf32>
    %cst_41 = arith.constant dense<0.000000e+00> : vector<32x128xf32>
    %44 = tpu.matmul %37, %35, %cst_41 {dimension_numbers = #tpu.dot_dimension_numbers<[1], [0], [0], [1], [0, 0, 1, 1], [], []>} : vector<32x16xf32>, vector<16x128xf32>, vector<32x128xf32> -> vector<32x128xf32>
    %45 = vector.broadcast %39 : vector<32x1xf32> to vector<32x128xf32>
    %46 = arith.addf %44, %45 : vector<32x128xf32>
    %cst_42 = arith.constant 0.000000e+00 : f32
    %47 = vector.broadcast %cst_42 : f32 to vector<32x128xf32>
    %48 = arith.maximumf %46, %47 : vector<32x128xf32>
    %cst_43 = arith.constant dense<0.000000e+00> : vector<16x128xf32>
    %49 = tpu.matmul %41, %48, %cst_43 {dimension_numbers = #tpu.dot_dimension_numbers<[1], [0], [0], [1], [0, 0, 1, 1], [], []>} : vector<16x32xf32>, vector<32x128xf32>, vector<16x128xf32> -> vector<16x128xf32>
    %50 = vector.broadcast %43 : vector<16x1xf32> to vector<16x128xf32>
    %51 = arith.addf %49, %50 : vector<16x128xf32>
    %52 = arith.addf %18, %51 : vector<16x128xf32>
    %c3 = arith.constant 3 : index
    %c0_44 = arith.constant 0 : index
    %c0_45 = arith.constant 0 : index
    %53 = vector.load %arg2[%c3, %c0_44, %c0_45] : memref<4x32x16xf32, #tpu.memory_space<vmem>>, vector<1x32x16xf32>
    %54 = vector.shape_cast %53 : vector<1x32x16xf32> to vector<32x16xf32>
    %c3_46 = arith.constant 3 : index
    %c0_47 = arith.constant 0 : index
    %c0_48 = arith.constant 0 : index
    %55 = vector.load %arg4[%c3_46, %c0_47, %c0_48] : memref<4x32x1xf32, #tpu.memory_space<vmem>>, vector<1x32x1xf32>
    %56 = vector.shape_cast %55 : vector<1x32x1xf32> to vector<32x1xf32>
    %c3_49 = arith.constant 3 : index
    %c0_50 = arith.constant 0 : index
    %c0_51 = arith.constant 0 : index
    %57 = vector.load %arg3[%c3_49, %c0_50, %c0_51] : memref<4x16x32xf32, #tpu.memory_space<vmem>>, vector<1x16x32xf32>
    %58 = vector.shape_cast %57 : vector<1x16x32xf32> to vector<16x32xf32>
    %c3_52 = arith.constant 3 : index
    %c0_53 = arith.constant 0 : index
    %c0_54 = arith.constant 0 : index
    %59 = vector.load %arg5[%c3_52, %c0_53, %c0_54] : memref<4x16x1xf32, #tpu.memory_space<vmem>>, vector<1x16x1xf32>
    %60 = vector.shape_cast %59 : vector<1x16x1xf32> to vector<16x1xf32>
    %cst_55 = arith.constant dense<0.000000e+00> : vector<32x128xf32>
    %61 = tpu.matmul %54, %52, %cst_55 {dimension_numbers = #tpu.dot_dimension_numbers<[1], [0], [0], [1], [0, 0, 1, 1], [], []>} : vector<32x16xf32>, vector<16x128xf32>, vector<32x128xf32> -> vector<32x128xf32>
    %62 = vector.broadcast %56 : vector<32x1xf32> to vector<32x128xf32>
    %63 = arith.addf %61, %62 : vector<32x128xf32>
    %cst_56 = arith.constant 0.000000e+00 : f32
    %64 = vector.broadcast %cst_56 : f32 to vector<32x128xf32>
    %65 = arith.maximumf %63, %64 : vector<32x128xf32>
    %cst_57 = arith.constant dense<0.000000e+00> : vector<16x128xf32>
    %66 = tpu.matmul %58, %65, %cst_57 {dimension_numbers = #tpu.dot_dimension_numbers<[1], [0], [0], [1], [0, 0, 1, 1], [], []>} : vector<16x32xf32>, vector<32x128xf32>, vector<16x128xf32> -> vector<16x128xf32>
    %67 = vector.broadcast %60 : vector<16x1xf32> to vector<16x128xf32>
    %68 = arith.addf %66, %67 : vector<16x128xf32>
    %69 = arith.addf %35, %68 : vector<16x128xf32>
    %c0_58 = arith.constant 0 : index
    %c0_59 = arith.constant 0 : index
    %70 = vector.load %arg6[%c0_58, %c0_59] : memref<32x1xf32, #tpu.memory_space<vmem>>, vector<16x1xf32>
    %71 = vector.broadcast %70 : vector<16x1xf32> to vector<16x128xf32>
    %72 = arith.mulf %69, %71 : vector<16x128xf32>
    %c0_60 = arith.constant 0 : index
    %c0_61 = arith.constant 0 : index
    %73 = vector.load %arg7[%c0_60, %c0_61] : memref<32x128xf32, #tpu.memory_space<vmem>>, vector<16x128xf32>
    tpu.vector_store %arg7[%c0_60, %c0_61], %72 {strides = array<i32>} : memref<32x128xf32, #tpu.memory_space<vmem>>, vector<16x128xf32>,
    %c16_62 = arith.constant 16 : index
    %c0_63 = arith.constant 0 : index
    %74 = vector.load %arg6[%c16_62, %c0_63] : memref<32x1xf32, #tpu.memory_space<vmem>>, vector<16x1xf32>
    %75 = vector.broadcast %74 : vector<16x1xf32> to vector<16x128xf32>
    %76 = arith.mulf %52, %75 : vector<16x128xf32>
    %c16_64 = arith.constant 16 : index
    %c0_65 = arith.constant 0 : index
    %77 = vector.load %arg7[%c16_64, %c0_65] : memref<32x128xf32, #tpu.memory_space<vmem>>, vector<16x128xf32>
    tpu.vector_store %arg7[%c16_64, %c0_65], %76 {strides = array<i32>} : memref<32x128xf32, #tpu.memory_space<vmem>>, vector<16x128xf32>,
    return
  }
  func.func @transform_0(%arg0: i32) -> (i32, i32) {
    %c0_i32 = arith.constant 0 : i32
    %c0_i32_0 = arith.constant 0 : i32
    return %c0_i32, %arg0 : i32, i32
  }
  func.func @transform_1(%arg0: i32) -> (i32, i32, i32) {
    %c0_i32 = arith.constant 0 : i32
    %c0_i32_0 = arith.constant 0 : i32
    %c0_i32_1 = arith.constant 0 : i32
    %c0_i32_2 = arith.constant 0 : i32
    return %c0_i32, %c0_i32_0, %c0_i32_1 : i32, i32, i32
  }
  func.func @transform_2(%arg0: i32) -> (i32, i32, i32) {
    %c0_i32 = arith.constant 0 : i32
    %c0_i32_0 = arith.constant 0 : i32
    %c0_i32_1 = arith.constant 0 : i32
    %c0_i32_2 = arith.constant 0 : i32
    return %c0_i32, %c0_i32_0, %c0_i32_1 : i32, i32, i32
  }
  func.func @transform_3(%arg0: i32) -> (i32, i32, i32) {
    %c0_i32 = arith.constant 0 : i32
    %c0_i32_0 = arith.constant 0 : i32
    %c0_i32_1 = arith.constant 0 : i32
    %c0_i32_2 = arith.constant 0 : i32
    return %c0_i32, %c0_i32_0, %c0_i32_1 : i32, i32, i32
  }
  func.func @transform_4(%arg0: i32) -> (i32, i32, i32) {
    %c0_i32 = arith.constant 0 : i32
    %c0_i32_0 = arith.constant 0 : i32
    %c0_i32_1 = arith.constant 0 : i32
    %c0_i32_2 = arith.constant 0 : i32
    return %c0_i32, %c0_i32_0, %c0_i32_1 : i32, i32, i32
  }
  func.func @transform_5(%arg0: i32) -> (i32, i32) {
    %c0_i32 = arith.constant 0 : i32
    %c0_i32_0 = arith.constant 0 : i32
    %c0_i32_1 = arith.constant 0 : i32
    return %c0_i32, %c0_i32_0 : i32, i32
  }
  func.func @transform_6(%arg0: i32) -> (i32, i32) {
    %c0_i32 = arith.constant 0 : i32
    %c0_i32_0 = arith.constant 0 : i32
    return %c0_i32, %arg0 : i32, i32
  }
}

</mosaic_0001>

<bundles_post_ra>
// kernel: nice_forward.1
= control target key start
LH: loop header
LB: loop body
LE: loop exit
PB: predicated region body
PF: predicated region fallthrough
CT: control target
= control target key end

     0   :  { %vm59_vm0 = vcmask 130048   ;;  %v1224_v3 = vmov 0   ;;  %vm171_vm1 = vcmask 261120   ;;  %s1488_s0 = inlined_call_operand.vmem [shape: f32[32,128], index: 0, kind: input, shape index: {}]   ;;  %s1489_s1 = inlined_call_operand.vmem [shape: f32[4,32,16], index: 1, kind: input, shape index: {}]   ;;  %s1490_s3 = inlined_call_operand.vmem [shape: f32[4,32,1], index: 3, kind: input, shape index: {}]   ;;  %s1491_s4 = inlined_call_operand.vmem [shape: f32[4,16,1], index: 4, kind: input, shape index: {}]   ;;  %s1492_s5 = inlined_call_operand.vmem [shape: f32[32,1], index: 5, kind: input, shape index: {}]   ;;  %s1493_s2 = inlined_call_operand.vmem [shape: f32[4,16,32], index: 2, kind: input, shape index: {}]   ;;  %s1494_s6 = inlined_call_operand.vmem [shape: f32[32,128], index: 6, kind: output, shape index: {}]  }
   0x1   :  { %v1263_v0 = vld [vmem:[%s1488_s0] sm:$0xff]  ;;  %v1268_v1 = vld [vmem:[%s1488_s0 + $0x8] sm:$0xff]  ;;  %1222 = vset.pattern.permute.xlu0 %v1224_v3  ;;  %1223 = vset.pattern.permute.xlu1 %v1224_v3  ;;  %v33_v6 = vld [vmem:[%s1490_s3 + $0x10] sm:$0xff] }
   0x2   :  { %v27_v2 = vld [vmem:[%s1489_s1] sm:$0xff]  ;;  %v1173_v4 = vpack.c.bf16 %v1268_v1, %v1263_v0  ;;  %v28_v7 = vld [vmem:[%s1489_s1 + $0x8] sm:$0xff]  ;;  %51 = vperm.xlu1 %1223, %v33_v6   ;;  %v29_v9 = vld [vmem:[%s1489_s1 + $0x10] sm:$0xff] }
   0x3   :  { %1093 = vmatprep.mubr.msk.f32.mxu0 %vm59_vm0, %v27_v2  ;;  %v31_v5 = vld [vmem:[%s1490_s3] sm:$0xff]  ;;  %v32_v8 = vld [vmem:[%s1490_s3 + $0x8] sm:$0xff]  ;;  %v34_v10 = vld [vmem:[%s1490_s3 + $0x18] sm:$0xff] }
   0x4   :  { %1174 = vmatprep.subr.bf16.mxu0 %v1173_v4  ;;  %41 = vperm.xlu0 %1222, %v31_v5   ;;  %v30_v11 = vld [vmem:[%s1489_s1 + $0x18] sm:$0xff]  ;;  %v37_v12 = vld [vmem:[%s1491_s4] sm:$0xff]  ;;  %v38_v13 = vld [vmem:[%s1491_s4 + $0x8] sm:$0xff] }
   0x5   :  { %1176 = vmatpush3.bf16.msra.mxu0 %v1173_v4  ;;  %v991_v14 = vld [vmem:[%s1490_s3 + $0x20] sm:$0xff]  ;;  %v992_v15 = vld [vmem:[%s1490_s3 + $0x28] sm:$0xff]  ;;  %v993_v16 = vld [vmem:[%s1490_s3 + $0x30] sm:$0xff] }
   0x6   :  { %56 = vperm.xlu1 %1223, %v34_v10   ;;  %v994_v17 = vld [vmem:[%s1490_s3 + $0x38] sm:$0xff]  ;;  %v997_v18 = vld [vmem:[%s1491_s4 + $0x10] sm:$0xff]  ;;  %v1009_v20 = vld [vmem:[%s1490_s3 + $0x40] sm:$0xff] }
   0x7   :  { %v998_v19 = vld [vmem:[%s1491_s4 + $0x18] sm:$0xff]  ;;  %v1010_v21 = vld [vmem:[%s1490_s3 + $0x48] sm:$0xff]  ;;  %v1011_v22 = vld [vmem:[%s1490_s3 + $0x50] sm:$0xff] }
   0x8   :  { %1094 = vmatmul.mubr.msk.f32.vlgmr.msra.gmra.mrb[0].mxu0 %vm59_vm0, %v28_v7  ;;  %46 = vperm.xlu0 %1222, %v32_v8   ;;  %v1012_v23 = vld [vmem:[%s1490_s3 + $0x58] sm:$0xff]  ;;  %v1015_v24 = vld [vmem:[%s1491_s4 + $0x20] sm:$0xff]  ;;  %v1016_v25 = vld [vmem:[%s1491_s4 + $0x28] sm:$0xff] }
   0x9   :  { %1096 = vmatprep.mubr.msk.f32.mxu0 %vm59_vm0, %v29_v9  ;;  %v1027_v26 = vld [vmem:[%s1490_s3 + $0x60] sm:$0xff]  ;;  %v1028_v27 = vld [vmem:[%s1490_s3 + $0x68] sm:$0xff]  ;;  %v1029_v28 = vld [vmem:[%s1490_s3 + $0x70] sm:$0xff] }
   0xa   :  { %168 = vperm.xlu1 %1223, %v38_v13   ;;  %v1030_v29 = vld [vmem:[%s1490_s3 + $0x78] sm:$0xff]  ;;  %v1033_v30 = vld [vmem:[%s1491_s4 + $0x30] sm:$0xff]  ;;  %v945_v32 = vld [vmem:[%s1492_s5] sm:$0xff] }
   0xb   :  { %v1034_v31 = vld [vmem:[%s1491_s4 + $0x38] sm:$0xff]  ;;  %v946_v33 = vld [vmem:[%s1492_s5 + $0x8] sm:$0xff]  ;;  %v961_v34 = vld [vmem:[%s1492_s5 + $0x10] sm:$0xff] }
   0xc   :  { %1097 = vmatmul.mubr.msk.f32.gmra.mrb[2].mxu0 %vm59_vm0, %v30_v11  ;;  %163 = vperm.xlu0 %1222, %v37_v12   ;;  %v962_v35 = vld [vmem:[%s1492_s5 + $0x18] sm:$0xff]  ;;  %v35_v36 = vld [vmem:[%s1493_s2] sm:$0xff]  ;;  %v36_v55 = vld [vmem:[%s1493_s2 + $0x8] sm:$0xff] }
   0xd   :  { %1107 = vmatprep.mubr.msk.f32.mxu1 %vm171_vm1, %v35_v36  ;;  %v987_v56 = vld [vmem:[%s1489_s1 + $0x20] sm:$0xff]  ;;  %v26_v58 = vld [vmem:[%s1488_s0 + $0x18] sm:$0xff]  ;;  %v25_v62 = vld [vmem:[%s1488_s0 + $0x10] sm:$0xff] }
   0xe   :  { %278 = vperm.xlu1 %1223, %v992_v15   ;;  %1114 = vmatprep.mubr.msk.f32.mxu0 %vm59_vm0, %v987_v56  ;;  %v988_v6 = vld [vmem:[%s1489_s1 + $0x28] sm:$0xff]  ;;  %v989_v7 = vld [vmem:[%s1489_s1 + $0x30] sm:$0xff]  ;;  %v990_v8 = vld [vmem:[%s1489_s1 + $0x38] sm:$0xff] }
   0xf   :  { %v995_v9 = vld [vmem:[%s1493_s2 + $0x10] sm:$0xff] }
  0x10   :  { %273 = vperm.xlu0 %1222, %v991_v14  }
  0x12   :  { %288 = vperm.xlu1 %1223, %v994_v17  }
  0x14   :  { %283 = vperm.xlu0 %1222, %v993_v16  }
  0x16   :  { %399 = vperm.xlu1 %1223, %v998_v19  }
  0x18   :  { %394 = vperm.xlu0 %1222, %v997_v18  }
  0x1a   :  { %508 = vperm.xlu1 %1223, %v1010_v21  }
  0x1c   :  { %503 = vperm.xlu0 %1222, %v1009_v20  }
  0x1e   :  { %518 = vperm.xlu1 %1223, %v1012_v23  }
  0x20   :  { %513 = vperm.xlu0 %1222, %v1011_v22  }
  0x22   :  { %629 = vperm.xlu1 %1223, %v1016_v25  }
  0x24   :  { %624 = vperm.xlu0 %1222, %v1015_v24  }
  0x26   :  { %738 = vperm.xlu1 %1223, %v1028_v27  }
  0x28   :  { %733 = vperm.xlu0 %1222, %v1027_v26  }
  0x2a   :  { %748 = vperm.xlu1 %1223, %v1030_v29   ;;  %v1005_v29 = vld [vmem:[%s1489_s1 + $0x40] sm:$0xff] }
  0x2c   :  { %743 = vperm.xlu0 %1222, %v1029_v28   ;;  %v996_v28 = vld [vmem:[%s1493_s2 + $0x18] sm:$0xff] }
  0x2e   :  { %859 = vperm.xlu1 %1223, %v1034_v31  }
  0x30   :  { %854 = vperm.xlu0 %1222, %v1033_v30  }
  0x32   :  { %954 = vperm.xlu1 %1223, %v946_v33  }
  0x34   :  { %949 = vperm.xlu0 %1222, %v945_v32  }
  0x36   :  { %970 = vperm.xlu1 %1223, %v962_v35  }
  0x38   :  { %965 = vperm.xlu0 %1222, %v961_v34  }
  0x81   :  { %v52_v38 = vpop.permute.xlu1 %51 }
  0x83   :  { %v42_v37 = vpop.permute.xlu0 %41 }
  0x85   :  { %v57_v45 = vpop.permute.xlu1 %56 }
  0x87   :  { %v47_v39 = vpop.permute.xlu0 %46 }
  0x89   :  { %v169_v57 = vpop.permute.xlu1 %168 }
  0x8b   :  { %v164_v60 = vpop.permute.xlu0 %163 }
  0x8d   :  { %v279_v10 = vpop.permute.xlu1 %278 }
  0x8f   :  { %v274_v11 = vpop.permute.xlu0 %273 }
  0x91   :  { %v289_v17 = vpop.permute.xlu1 %288 }
  0x93   :  { %v284_v20 = vpop.permute.xlu0 %283 }
  0x95   :  { %v400_v30 = vpop.permute.xlu1 %399 }
  0x97   :  { %v395_v32 = vpop.permute.xlu0 %394 }
  0xdb   :  { %v1095_v40 = vpop.f32.mrb[0].mxu0 }
  0xdc   :  { %v144_v41 = vadd.f32 %v1095_v40, %v47_v39  ;;  %v138_v42 = vpop.f32.mrb[1].mxu0  ;;  %v1006_v39 = vld [vmem:[%s1489_s1 + $0x48] sm:$0xff]  ;;  %v1007_v40 = vld [vmem:[%s1489_s1 + $0x50] sm:$0xff] }
  0xdd   :  { %v139_v43 = vadd.f32 %v138_v42, %v42_v37  ;;  %v504_v42 = vpop.permute.xlu0 %503 }
  0xde   :  { %v158_v44 = vmax.f32 %v144_v41, 0.0  ;;  %v509_v41 = vpop.permute.xlu1 %508 }
  0xdf   :  { %v157_v46 = vmax.f32 %v139_v43, 0.0  ;;  %v1098_v47 = vpop.f32.mrb[2].mxu0 }
  0xe0   :  { %v154_v48 = vadd.f32 %v1098_v47, %v57_v45  ;;  %v148_v49 = vpop.f32.mrb[3].mxu0 }
  0xe1   :  { %v149_v50 = vadd.f32 %v148_v49, %v52_v38  ;;  %v1177_v51 = vpack.c.bf16 %v158_v44, %v157_v46 }
  0xe2   :  { %v160_v52 = vmax.f32 %v154_v48, 0.0  ;;  %v519_v48 = vpop.permute.xlu1 %518 }
  0xe3   :  { %v159_v53 = vmax.f32 %v149_v50, 0.0  ;;  %1178 = vmatprep.subr.bf16.mxu1 %v1177_v51 }
  0xe4   :  { %1180 = vmatpush3.bf16.msra.mxu1 %v1177_v51  ;;  %v514_v51 = vpop.permute.xlu0 %513 }
  0xe5   :  { %v1181_v54 = vpack.c.bf16 %v160_v52, %v159_v53 }
  0xe7   :  { %1182 = vmatprep.subr.bf16.mxu1 %v1181_v54 }
  0xe8   :  { %1184 = vmatpush3.bf16.msra.mxu1 %v1181_v54 }
  0xeb   :  { %1108 = vmatmul.mubr.msk.f32.vlgmr.msra.gmra.mrb[0].mxu1 %vm171_vm1, %v36_v55 }
  0xec   :  { %1128 = vmatprep.mubr.msk.f32.mxu1 %vm171_vm1, %v995_v9 }
 0x1be   :  { %v1109_v59 = vpop.f32.mrb[0].mxu1 }
 0x1bf   :  { %v250_v61 = vadd.f32 %v1109_v59, %v169_v57  ;;  %v244_v63 = vpop.f32.mrb[1].mxu1  ;;  %v1014_v59 = vld [vmem:[%s1493_s2 + $0x28] sm:$0xff] }
 0x1c0   :  { %v245_v2 = vadd.f32 %v244_v63, %v164_v60  ;;  %v1023_v60 = vld [vmem:[%s1489_s1 + $0x60] sm:$0xff] }
 0x1c1   :  { %v1390_v3 = vadd.f32 %v250_v61, %v26_v58  ;;  %v630_v61 = vpop.permute.xlu1 %629 }
 0x1c2   :  { %v1392_v4 = vadd.f32 %v245_v2, %v25_v62  ;;  %v625_v62 = vpop.permute.xlu0 %624 }
 0x1c4   :  { %v1185_v5 = vpack.c.bf16 %v1390_v3, %v1392_v4 }
 0x1c5   :  { %v739_v63 = vpop.permute.xlu1 %738 }
 0x1c6   :  { %1186 = vmatprep.subr.bf16.mxu0 %v1185_v5  ;;  %v734_v2 = vpop.permute.xlu0 %733 }
 0x1c7   :  { %1188 = vmatpush3.bf16.msra.mxu0 %v1185_v5 }
 0x1c9   :  { %v749_v5 = vpop.permute.xlu1 %748 }
 0x1ca   :  { %1115 = vmatmul.mubr.msk.f32.vlgmr.msra.gmra.mrb[4].mxu0 %vm59_vm0, %v988_v6  ;;  %v744_v6 = vpop.permute.xlu0 %743 }
 0x1cb   :  { %1117 = vmatprep.mubr.msk.f32.mxu0 %vm59_vm0, %v989_v7 }
 0x1cd   :  { %v860_v7 = vpop.permute.xlu1 %859 }
 0x1ce   :  { %1118 = vmatmul.mubr.msk.f32.gmra.mrb[6].mxu0 %vm59_vm0, %v990_v8  ;;  %v855_v8 = vpop.permute.xlu0 %854 }
 0x1cf   :  { %1135 = vmatprep.mubr.msk.f32.mxu0 %vm59_vm0, %v1005_v29 }
 0x1d1   :  { %v955_v9 = vpop.permute.xlu1 %954 }
 0x29d   :  { %v1116_v12 = vpop.f32.mrb[4].mxu0 }
 0x29e   :  { %v375_v13 = vadd.f32 %v1116_v12, %v279_v10  ;;  %v369_v14 = vpop.f32.mrb[5].mxu0  ;;  %v950_v10 = vpop.permute.xlu0 %949 }
 0x29f   :  { %v370_v15 = vadd.f32 %v369_v14, %v274_v11 }
 0x2a0   :  { %v389_v16 = vmax.f32 %v375_v13, 0.0 }
 0x2a1   :  { %v388_v18 = vmax.f32 %v370_v15, 0.0  ;;  %v1119_v19 = vpop.f32.mrb[6].mxu0 }
 0x2a2   :  { %v385_v21 = vadd.f32 %v1119_v19, %v289_v17  ;;  %v379_v22 = vpop.f32.mrb[7].mxu0 }
 0x2a3   :  { %v1189_v23 = vpack.c.bf16 %v389_v16, %v388_v18  ;;  %v380_v24 = vadd.f32 %v379_v22, %v284_v20  ;;  %v971_v16 = vpop.permute.xlu1 %970  ;;  %v966_v18 = vpop.permute.xlu0 %965  ;;  %v1026_v22 = vld [vmem:[%s1489_s1 + $0x78] sm:$0xff] }
 0x2a4   :  { %v391_v25 = vmax.f32 %v385_v21, 0.0 }
 0x2a5   :  { %v390_v26 = vmax.f32 %v380_v24, 0.0  ;;  %1190 = vmatprep.subr.bf16.mxu1 %v1189_v23 }
 0x2a6   :  { %1192 = vmatpush3.bf16.msra.mxu1 %v1189_v23  ;;  %v1031_v23 = vld [vmem:[%s1493_s2 + $0x30] sm:$0xff] }
 0x2a7   :  { %v1193_v27 = vpack.c.bf16 %v391_v25, %v390_v26 }
 0x2a9   :  { %1194 = vmatprep.subr.bf16.mxu1 %v1193_v27 }
 0x2aa   :  { %1196 = vmatpush3.bf16.msra.mxu1 %v1193_v27 }
 0x2ad   :  { %1129 = vmatmul.mubr.msk.f32.vlgmr.msra.gmra.mrb[2].mxu1 %vm171_vm1, %v996_v28 }
 0x380   :  { %v1130_v31 = vpop.f32.mrb[2].mxu1 }
 0x381   :  { %v480_v33 = vadd.f32 %v1130_v31, %v400_v30  ;;  %v474_v34 = vpop.f32.mrb[3].mxu1 }
 0x382   :  { %v475_v35 = vadd.f32 %v474_v34, %v395_v32 }
 0x383   :  { %v1421_v36 = vadd.f32 %v480_v33, %v1268_v1  ;;  %v1013_v1 = vld [vmem:[%s1493_s2 + $0x20] sm:$0xff] }
 0x384   :  { %v1424_v37 = vadd.f32 %v475_v35, %v1263_v0  ;;  %v1008_v0 = vld [vmem:[%s1489_s1 + $0x58] sm:$0xff]  ;;  %1149 = vmatprep.mubr.msk.f32.mxu1 %vm171_vm1, %v1013_v1 }
 0x386   :  { %v1197_v38 = vpack.c.bf16 %v1421_v36, %v1424_v37 }
 0x388   :  { %1198 = vmatprep.subr.bf16.mxu0 %v1197_v38 }
 0x389   :  { %1200 = vmatpush3.bf16.msra.mxu0 %v1197_v38 }
 0x38c   :  { %1136 = vmatmul.mubr.msk.f32.vlgmr.msra.gmra.mrb[8].mxu0 %vm59_vm0, %v1006_v39 }
 0x38d   :  { %1138 = vmatprep.mubr.msk.f32.mxu0 %vm59_vm0, %v1007_v40  ;;  %v1032_v40 = vld [vmem:[%s1493_s2 + $0x38] sm:$0xff] }
 0x390   :  { %1139 = vmatmul.mubr.msk.f32.gmra.mrb[10].mxu0 %vm59_vm0, %v1008_v0 }
 0x391   :  { %1156 = vmatprep.mubr.msk.f32.mxu0 %vm59_vm0, %v1023_v60 }
 0x45f   :  { %v1137_v43 = vpop.f32.mrb[8].mxu0 }
 0x460   :  { %v605_v44 = vadd.f32 %v1137_v43, %v509_v41  ;;  %v599_v45 = vpop.f32.mrb[9].mxu0 }
 0x461   :  { %v600_v46 = vadd.f32 %v599_v45, %v504_v42 }
 0x462   :  { %v619_v47 = vmax.f32 %v605_v44, 0.0 }
 0x463   :  { %v618_v49 = vmax.f32 %v600_v46, 0.0  ;;  %v1140_v50 = vpop.f32.mrb[10].mxu0 }
 0x464   :  { %v615_v52 = vadd.f32 %v1140_v50, %v519_v48  ;;  %v609_v53 = vpop.f32.mrb[11].mxu0 }
 0x465   :  { %v1201_v54 = vpack.c.bf16 %v619_v47, %v618_v49  ;;  %v610_v55 = vadd.f32 %v609_v53, %v514_v51 }
 0x466   :  { %v621_v56 = vmax.f32 %v615_v52, 0.0 }
 0x467   :  { %v620_v57 = vmax.f32 %v610_v55, 0.0  ;;  %1202 = vmatprep.subr.bf16.mxu1 %v1201_v54 }
 0x468   :  { %1204 = vmatpush3.bf16.msra.mxu1 %v1201_v54 }
 0x469   :  { %v1205_v58 = vpack.c.bf16 %v621_v56, %v620_v57 }
 0x46b   :  { %1206 = vmatprep.subr.bf16.mxu1 %v1205_v58 }
 0x46c   :  { %1208 = vmatpush3.bf16.msra.mxu1 %v1205_v58 }
 0x46f   :  { %1150 = vmatmul.mubr.msk.f32.vlgmr.msra.gmra.mrb[4].mxu1 %vm171_vm1, %v1014_v59 }
 0x470   :  { %1170 = vmatprep.mubr.msk.f32.mxu1 %vm171_vm1, %v1031_v23 }
 0x542   :  { %v1151_v11 = vpop.f32.mrb[4].mxu1 }
 0x543   :  { %v710_v12 = vadd.f32 %v1151_v11, %v630_v61  ;;  %v704_v13 = vpop.f32.mrb[5].mxu1 }
 0x544   :  { %v705_v14 = vadd.f32 %v704_v13, %v625_v62 }
 0x545   :  { %v714_v15 = vadd.f32 %v710_v12, %v1390_v3  ;;  %v1024_v3 = vld [vmem:[%s1489_s1 + $0x68] sm:$0xff] }
 0x546   :  { %v713_v17 = vadd.f32 %v705_v14, %v1392_v4  ;;  %v1025_v4 = vld [vmem:[%s1489_s1 + $0x70] sm:$0xff] }
 0x547   :  { %v974_v19 = vmul.f32 %v971_v16, %v714_v15 }
 0x548   :  { %v973_v20 = vmul.f32 %v966_v18, %v713_v17  ;;  %v1209_v21 = vpack.c.bf16 %v714_v15, %v713_v17 }
 0x549   :  { %976 = vst [vmem:[%s1494_s6 + $0x18] sm:$0xff] %v974_v19 }
 0x54a   :  { %975 = vst [vmem:[%s1494_s6 + $0x10] sm:$0xff] %v973_v20  ;;  %1210 = vmatprep.subr.bf16.mxu0 %v1209_v21 }
 0x54b   :  { %1212 = vmatpush3.bf16.msra.mxu0 %v1209_v21 }
 0x54e   :  { %1157 = vmatmul.mubr.msk.f32.vlgmr.msra.gmra.mrb[12].mxu0 %vm59_vm0, %v1024_v3 }
 0x54f   :  { %1159 = vmatprep.mubr.msk.f32.mxu0 %vm59_vm0, %v1025_v4 }
 0x552   :  { %1160 = vmatmul.mubr.msk.f32.gmra.mrb[14].mxu0 %vm59_vm0, %v1026_v22 }
 0x621   :  { %v1158_v24 = vpop.f32.mrb[12].mxu0 }
 0x622   :  { %v835_v25 = vadd.f32 %v1158_v24, %v739_v63  ;;  %v829_v26 = vpop.f32.mrb[13].mxu0 }
 0x623   :  { %v830_v27 = vadd.f32 %v829_v26, %v734_v2 }
 0x624   :  { %v849_v28 = vmax.f32 %v835_v25, 0.0 }
 0x625   :  { %v848_v29 = vmax.f32 %v830_v27, 0.0  ;;  %v1161_v30 = vpop.f32.mrb[14].mxu0 }
 0x626   :  { %v845_v31 = vadd.f32 %v1161_v30, %v749_v5  ;;  %v839_v32 = vpop.f32.mrb[15].mxu0 }
 0x627   :  { %v1213_v33 = vpack.c.bf16 %v849_v28, %v848_v29  ;;  %v840_v34 = vadd.f32 %v839_v32, %v744_v6 }
 0x628   :  { %v851_v35 = vmax.f32 %v845_v31, 0.0 }
 0x629   :  { %v850_v38 = vmax.f32 %v840_v34, 0.0  ;;  %1214 = vmatprep.subr.bf16.mxu1 %v1213_v33 }
 0x62a   :  { %1216 = vmatpush3.bf16.msra.mxu1 %v1213_v33 }
 0x62b   :  { %v1217_v39 = vpack.c.bf16 %v851_v35, %v850_v38 }
 0x62d   :  { %1218 = vmatprep.subr.bf16.mxu1 %v1217_v39 }
 0x62e   :  { %1220 = vmatpush3.bf16.msra.mxu1 %v1217_v39 }
 0x631   :  { %1171 = vmatmul.mubr.msk.f32.vlgmr.msra.gmra.mrb[6].mxu1 %vm171_vm1, %v1032_v40 }
 0x704   :  { %v1172_v0 = vpop.f32.mrb[6].mxu1 }
 0x705   :  { %v940_v1 = vadd.f32 %v1172_v0, %v860_v7  ;;  %v934_v41 = vpop.f32.mrb[7].mxu1 }
 0x706   :  { %v935_v42 = vadd.f32 %v934_v41, %v855_v8 }
 0x707   :  { %v944_v43 = vadd.f32 %v940_v1, %v1421_v36 }
 0x708   :  { %v943_v44 = vadd.f32 %v935_v42, %v1424_v37 }
 0x709   :  { %v958_v45 = vmul.f32 %v955_v9, %v944_v43 }
 0x70a   :  { %v957_v46 = vmul.f32 %v950_v10, %v943_v44 }
 0x70b   :  { %960 = vst [vmem:[%s1494_s6 + $0x8] sm:$0xff] %v958_v45 }
 0x70c   :  { %959 = vst [vmem:[%s1494_s6] sm:$0xff] %v957_v46 }

</bundles_post_ra>
